<compile_context>
chip_gen: v5e
topology: v5e:2x2
jax: 0.10.0
libtpu: 0.0.40
codegen_flags: <defaults>
</compile_context>

<pallas_src>
import jax
import jax.numpy as jnp
from jax.experimental import pallas as pl
from jax.experimental.pallas import tpu as pltpu


# ----------------------------------------------------------------------------
# Pallas kernels
# ----------------------------------------------------------------------------
def _toeplitz_matmul_kernel(t_ref, x_ref, o_ref):
    """Single-shot (full-K) tile matmul: (tm, K) @ (K, tn) -> (tm, tn)."""
    o_ref[...] = jnp.dot(
        t_ref[...], x_ref[...], preferred_element_type=jnp.float32
    ).astype(o_ref.dtype)


def _toeplitz_matmul_kernel_acc(t_ref, x_ref, o_ref, acc_ref):
    """K-tiled fallback (very long sequences): f32 accumulator in VMEM."""
    @pl.when(pl.program_id(2) == 0)
    def _():
        acc_ref[...] = jnp.zeros_like(acc_ref)

    acc_ref[...] += jnp.dot(
        t_ref[...], x_ref[...], preferred_element_type=jnp.float32
    )

    @pl.when(pl.program_id(2) == pl.num_programs(2) - 1)
    def _():
        o_ref[...] = acc_ref[...].astype(o_ref.dtype)


# ----------------------------------------------------------------------------
# Tiling helpers
# ----------------------------------------------------------------------------
_VMEM_WS_BUDGET = 28 << 20   # double-buffered working-set target (v7x-safe)


def _round_up(x, m):
    return (x + m - 1) // m * m


def _pick_tile(size, candidates):
    for c in candidates:
        if size % c == 0:
            return c
    return size  # single block spanning the whole (padded) dim


def _pad2d(x, r, c):
    if x.shape == (r, c):
        return x
    return jnp.pad(x, ((0, r - x.shape[0]), (0, c - x.shape[1])))


def _plan_no_k(Mp, K, Lp, out_bytes):
    """Pick (tm, tn, vmem_limit) for the single-shot kernel, or None if the
    full-K strips cannot fit the VMEM budget even with minimal tiles."""
    tm = _pick_tile(Mp, (512, 256, 128))
    tn = _pick_tile(Lp, (1024, 512, 256, 128))

    def ws(tm_, tn_):
        # double-buffered bf16 T strip + bf16 X strip + out tile
        return 2 * (tm_ * K * 2) + 2 * (K * tn_ * 2) + 2 * (tm_ * tn_ * out_bytes)

    while ws(tm, tn) > _VMEM_WS_BUDGET:
        if tn > 128:                       # tn always a multiple of 128 here
            tn //= 2
        elif tm > 128 and tm % 16 == 0:    # keep tm a multiple of 8, dividing Mp
            tm //= 2
        else:
            return None                    # fall back to K-tiled kernel

    # Guarantee >= 2 parallel blocks so v7x's second TensorCore has work even
    # on small problems (costs only ~0.35 us/step on single-core chips).
    if (Mp // tm) * (Lp // tn) < 2:
        if tn >= 256:
            tn //= 2
        elif tm >= 16 and tm % 16 == 0:
            tm //= 2

    vmem_limit = int(min(48 << 20, max(16 << 20, ws(tm, tn) + (8 << 20))))
    return tm, tn, vmem_limit


# ----------------------------------------------------------------------------
# out = T @ X on the MXU (bf16 inputs, f32 accumulation)
# ----------------------------------------------------------------------------
def toeplitz_matmul(T, X, *, out_dtype=None):
    """T: (M, K), X: (K, L), both already in the compute dtype (bf16)."""
    M, K = T.shape
    K2, L = X.shape
    assert K == K2, (T.shape, X.shape)
    out_dtype = out_dtype if out_dtype is not None else X.dtype
    out_bytes = jnp.dtype(out_dtype).itemsize

    Mp = _round_up(M, 8)          # second-minor dims only need /8
    Lp = _round_up(L, 128)        # lane-dense output
    plan = _plan_no_k(Mp, K, Lp, out_bytes)

    if plan is not None:
        tm, tn, vmem_limit = plan
        Tp = _pad2d(T, Mp, K)     # K is NOT padded: blocks span the full K dim
        Xp = _pad2d(X, K, Lp)
        grid = (Mp // tm, Lp // tn)
        gm = grid[0]
        cost = pl.CostEstimate(
            flops=2 * Mp * K * Lp,
            transcendentals=0,
            # T streams once (block index independent of inner axis j),
            # X is re-read once per i block, output written once.
            bytes_accessed=int(Mp * K * 2 + gm * K * Lp * 2 + Mp * Lp * out_bytes),
        )
        out = pl.pallas_call(
            _toeplitz_matmul_kernel,
            out_shape=jax.ShapeDtypeStruct((Mp, Lp), out_dtype),
            grid=grid,
            in_specs=[
                # T strip depends only on i -> DMA skipped across the j sweep.
                pl.BlockSpec((tm, K), lambda i, j: (i, 0)),
                pl.BlockSpec((K, tn), lambda i, j: (0, j)),
            ],
            out_specs=pl.BlockSpec((tm, tn), lambda i, j: (i, j)),
            compiler_params=pltpu.CompilerParams(
                dimension_semantics=("parallel", "parallel"),
                vmem_limit_bytes=vmem_limit,
            ),
            cost_estimate=cost,
        )(Tp, Xp)
    else:
        # K-tiled fallback (N > ~20K): accumulator kernel, K axis innermost.
        Mp = _round_up(M, 128)
        Kp = _round_up(K, 512)
        tm = _pick_tile(Mp, (256, 128))
        tn = _pick_tile(Lp, (512, 256, 128))
        tk = 512
        Tp = _pad2d(T, Mp, Kp)
        Xp = _pad2d(X, Kp, Lp)
        grid = (Mp // tm, Lp // tn, Kp // tk)
        out = pl.pallas_call(
            _toeplitz_matmul_kernel_acc,
            out_shape=jax.ShapeDtypeStruct((Mp, Lp), out_dtype),
            grid=grid,
            in_specs=[
                pl.BlockSpec((tm, tk), lambda i, j, k: (i, k)),
                pl.BlockSpec((tk, tn), lambda i, j, k: (k, j)),
            ],
            out_specs=pl.BlockSpec((tm, tn), lambda i, j, k: (i, j)),
            scratch_shapes=[pltpu.VMEM((tm, tn), jnp.float32)],
            compiler_params=pltpu.CompilerParams(
                dimension_semantics=("parallel", "parallel", "arbitrary"),
                vmem_limit_bytes=48 << 20,
            ),
        )(Tp, Xp)

    if out.shape != (M, L):
        out = out[:M, :L]
    return out


# ----------------------------------------------------------------------------
# Parameter / Toeplitz construction (glue, plain JAX; O(N^2) gather only)
# ----------------------------------------------------------------------------
def init_toeplitz_params(n, causal=False, use_exp=False, key=None, dtype=jnp.float32):
    """Shapes follow ToepliztV3.__init__: pos (n-1,), zero (1,), neg (n-1,)."""
    zero_value = float("-inf") if use_exp else 0.0
    if key is None:
        pos = jnp.ones((n - 1,), dtype)
        zero = jnp.ones((1,), dtype)
    else:
        kp, kz, kn = jax.random.split(key, 3)
        pos = 0.1 * jax.random.normal(kp, (n - 1,), dtype)
        zero = 1.0 + 0.1 * jax.random.normal(kz, (1,), dtype)
    if causal:
        neg = jnp.full((n - 1,), zero_value, dtype)
    else:
        if key is None:
            neg = jnp.ones((n - 1,), dtype)
        else:
            neg = 0.1 * jax.random.normal(kn, (n - 1,), dtype)
    return pos, zero, neg


def _build_a_vector(pos, zero, neg, n_param, seq_n, use_exp, dtype):
    """Mirror of forward()'s construction of `a` (length 2 * seq_n)."""
    zero_value = float("-inf") if use_exp else 0.0
    l1 = min(seq_n - 1, n_param - 1)
    l2 = max(0, seq_n - 1 - l1)
    fill = jnp.full((l2,), zero_value, dtype=dtype)
    pos_eff = jnp.concatenate([pos[:l1].astype(dtype), fill])
    neg_eff = jnp.concatenate([fill, neg[n_param - 1 - l1:].astype(dtype)])
    a = jnp.concatenate([zero.astype(dtype), pos_eff, zero.astype(dtype), neg_eff])
    if use_exp:
        a = jnp.exp(jnp.clip(a, -60.0, 30.0))
    return a  # (2 * seq_n,)


def toeplitz_v3_forward(
    x, pos, zero, neg, n_param, causal=False, use_exp=False, normalize=False,
    compute_dtype=jnp.bfloat16,
):
    """JAX/Pallas equivalent of ToepliztV3.forward(x, dim=-2, normalize=...)."""
    del causal  # causality is encoded in the `neg` parameter values
    B, H, N, D = x.shape
    a = _build_a_vector(pos, zero, neg, n_param, N, use_exp, jnp.float32)
    idx = (jnp.arange(N)[:, None] - jnp.arange(N)[None, :]) % (2 * N)
    if normalize:
        # Fold out / (T @ ones) into T (saves a full HBM pass over the output).
        # f32 gather + scale + one cast; matches PyTorch: no epsilon, so a zero
        # row-sum yields inf/nan exactly as the torch module would.
        Tf = a[idx]
        T = (Tf / jnp.sum(Tf, axis=-1, keepdims=True)).astype(compute_dtype)
    else:
        # Gather directly in bf16: half the gather traffic, no separate cast pass.
        T = a.astype(compute_dtype)[idx]
    # Lane-dense layout (L = B*H*D wide).  Cast BEFORE the transpose so the
    # transpose/reshape moves 2-byte, not 4-byte, data.
    X2 = jnp.transpose(x.astype(compute_dtype), (2, 0, 1, 3)).reshape(N, B * H * D)
    Y2 = toeplitz_matmul(T, X2, out_dtype=x.dtype)
    return jnp.transpose(Y2.reshape(N, B, H, D), (1, 2, 0, 3))


# ----------------------------------------------------------------------------
# Main
# ----------------------------------------------------------------------------
if __name__ == "__main__":
    B, H, N, D = 2, 4, 16, 32
    n_param = 16  # module's `n`
    causal = False
    use_exp = False

    key = jax.random.PRNGKey(0)
    k_params, k_x = jax.random.split(key)
    pos, zero, neg = init_toeplitz_params(
        n_param, causal=causal, use_exp=use_exp, key=k_params
    )
    x = jax.random.normal(k_x, (B, H, N, D), jnp.float32)

    fwd = jax.jit(
        toeplitz_v3_forward,
        static_argnames=("n_param", "causal", "use_exp", "normalize"),
    )

    out = fwd(x, pos, zero, neg, n_param=n_param, causal=causal,
              use_exp=use_exp, normalize=False)
    out = jax.block_until_ready(out)

    # References.
    a_ref = _build_a_vector(pos, zero, neg, n_param, N, use_exp, jnp.float32)
    idx = (jnp.arange(N)[:, None] - jnp.arange(N)[None, :]) % (2 * N)
    T_ref = a_ref[idx]
    X2_ref = jnp.transpose(x, (2, 0, 1, 3)).reshape(N, B * H * D)

    # (a) bf16-matched reference: same rounding as the kernel path (tight tol).
    ref_bf16 = jnp.dot(
        T_ref.astype(jnp.bfloat16), X2_ref.astype(jnp.bfloat16),
        preferred_element_type=jnp.float32,
    )
    ref_bf16 = jnp.transpose(ref_bf16.reshape(N, B, H, D), (1, 2, 0, 3))
    # (b) full-f32 reference (loose tol accounting for bf16 MXU inputs).
    ref_f32 = jnp.einsum("ij,bhjd->bhid", T_ref, x, precision="highest")

    assert out.shape == (B, H, N, D)
    assert out.dtype == x.dtype
    assert jnp.allclose(out, ref_bf16, atol=1e-4, rtol=1e-4)
    assert jnp.allclose(out, ref_f32, atol=3e-2, rtol=3e-2)

    # normalize=True path (row-sum division folded into T).
    out_n = fwd(x, pos, zero, neg, n_param=n_param, causal=causal,
                use_exp=use_exp, normalize=True)
    out_n = jax.block_until_ready(out_n)
    Tn = T_ref / jnp.sum(T_ref, axis=-1, keepdims=True)
    ref_n = jnp.dot(
        Tn.astype(jnp.bfloat16), X2_ref.astype(jnp.bfloat16),
        preferred_element_type=jnp.float32,
    )
    ref_n = jnp.transpose(ref_n.reshape(N, B, H, D), (1, 2, 0, 3))
    assert jnp.allclose(out_n, ref_n, atol=1e-3, rtol=1e-3)

    print("KERNEL_OK")
</pallas_src>

<mosaic_0001>
module attributes {stable_mosaic.version = 11 : i64} {
  func.func @_toeplitz_matmul_kernel(%arg0: i32, %arg1: i32, %arg2: memref<16x16xbf16, #tpu.memory_space<vmem>>, %arg3: memref<16x128xbf16, #tpu.memory_space<vmem>>, %arg4: memref<16x128xf32, #tpu.memory_space<vmem>>) attributes {dimension_semantics = [#tpu.dimension_semantics<parallel>, #tpu.dimension_semantics<parallel>], iteration_bounds = array<i64: 1, 2>, scalar_prefetch = 0 : i64, scratch_operands = 0 : i64, tpu.core_type = #tpu.core_type<tc>, window_params = [{transform_indices = @transform_0, window_bounds = array<i64: 16, 16>}, {transform_indices = @transform_1, window_bounds = array<i64: 16, 128>}, {transform_indices = @transform_2, window_bounds = array<i64: 16, 128>}]} {
    %c0 = arith.constant 0 : index
    %c0_0 = arith.constant 0 : index
    %0 = vector.load %arg2[%c0, %c0_0] : memref<16x16xbf16, #tpu.memory_space<vmem>>, vector<16x16xbf16>
    %c0_1 = arith.constant 0 : index
    %c0_2 = arith.constant 0 : index
    %1 = vector.load %arg3[%c0_1, %c0_2] : memref<16x128xbf16, #tpu.memory_space<vmem>>, vector<16x128xbf16>
    %cst = arith.constant dense<0.000000e+00> : vector<16x128xf32>
    %2 = tpu.matmul %0, %1, %cst {dimension_numbers = #tpu.dot_dimension_numbers<[1], [0], [0], [1], [0, 0, 1, 1], [], []>} : vector<16x16xbf16>, vector<16x128xbf16>, vector<16x128xf32> -> vector<16x128xf32>
    %c0_3 = arith.constant 0 : index
    %c0_4 = arith.constant 0 : index
    %3 = vector.load %arg4[%c0_3, %c0_4] : memref<16x128xf32, #tpu.memory_space<vmem>>, vector<16x128xf32>
    tpu.vector_store %arg4[%c0_3, %c0_4], %2 {strides = array<i32>} : memref<16x128xf32, #tpu.memory_space<vmem>>, vector<16x128xf32>,
    return
  }
  func.func @transform_0(%arg0: i32, %arg1: i32) -> (i32, i32) {
    %c0_i32 = arith.constant 0 : i32
    %c0_i32_0 = arith.constant 0 : i32
    return %arg0, %c0_i32 : i32, i32
  }
  func.func @transform_1(%arg0: i32, %arg1: i32) -> (i32, i32) {
    %c0_i32 = arith.constant 0 : i32
    %c0_i32_0 = arith.constant 0 : i32
    return %c0_i32, %arg1 : i32, i32
  }
  func.func @transform_2(%arg0: i32, %arg1: i32) -> (i32, i32) {
    %c0_i32 = arith.constant 0 : i32
    return %arg0, %arg1 : i32, i32
  }
}

</mosaic_0001>

<bundles_post_ra>
// kernel: toeplitz_v3_forward.1
= control target key start
LH: loop header
LB: loop body
LE: loop exit
PB: predicated region body
PF: predicated region fallthrough
CT: control target
= control target key end

     0   :  { %s509_s9 = smov 0   ;;  %s511_s10 = smov 0   ;;  %s584_s0 = inlined_call_operand.vmem [shape: bf16[16,16], index: 0, kind: input, shape index: {}]   ;;  %s585_s1 = inlined_call_operand.vmem [shape: bf16[16,256], index: 1, kind: input, shape index: {}]   ;;  %s586_s2 = inlined_call_operand.vmem [shape: f32[16,256], index: 2, kind: output, shape index: {}]  }
   0x1   :  { %s513_s11 = smov 0   ;;  %s515_s12 = smov 0  }
   0x2   :  { %s517_s13 = smov 0  }
   0x3 LB: > { %s21_s14 = sadd.s32 1, %s488_s12  ;;  %s389_s15 = sadd.s32 4294967295, %s492_s13   ;;  %s492_s13 = sphi %s517_s13, %s12_s13   ;;  %s488_s12 = sphi %s515_s12, %s591_s12   ;;  %s484_s11 = sphi %s513_s11, %s590_s11   ;;  %s480_s10 = sphi %s511_s10, %s589_s10   ;;  %s476_s9 = sphi %s509_s9, %s588_s9  }
   0x4   : > { %p22_p0 = scmp.ge.s32.totalorder %s21_s14, 2  ;;  %p64_p1 = scmp.ne.s32.totalorder %s480_s10, %s476_s9 }
   0x5   : > { %p65_p2 = scmp.eq.s32.totalorder %s492_s13, 0  ;;  %p96_p4 = scmp.eq.s32.totalorder %s389_s15, 1 }
   0x6   : > { %s593_s14 = smov (%p22_p0, %s21_s14), 0  ;;  %s57_s17 = sadd.s32 1, %s480_s10 }
   0x7   : > { %p66_p3 = por %p65_p2, %p64_p1  ;;  %s54_s16 = ssub.s32 %s488_s12, %s593_s14 }
   0x8   : > { %p55_p5 = scmp.eq.s32.totalorder %s54_s16, 0  ;;  %p544_p6 = por %p96_p4, %p64_p1 }
   0x9   : > { %p393_p7 = scmp.ge.s32.totalorder %s492_s13, 2 }
   0xa   : > { %s549_s19 = scalar_select %p55_p5, %s480_s10, %s57_s17  }
   0xb   : > { %127 = sbr.rel (%p393_p7) target bundleno = 22 (0x16), region = 20 }
  0x10   : > { %130 = sbr.rel (!%p66_p3) target bundleno = 22 (0x16), region = 24  ;;  %s132_s20 = sand.u32 (%p66_p3), 1, %s480_s10  }
  0x11   : > { %s395_s21 = sshll.u32 (%p66_p3), %s488_s12, 2  ;;  %s394_s22 = sshll.u32 (%p66_p3), %s132_s20, 3 }
  0x12   : > { %s136_s25 = scalar_lea.vmem (%p66_p3), %s585_s1, %s395_s21  ;;  %s134_s26 = scalar_lea.vmem (%p66_p3), [#allocation2], %s394_s22 }
  0x13   : > { %v153_v0 = vld [vmem:[%s136_s25] sm:$0xf] (%p66_p3)  ;;  %v155_v1 = vld [vmem:[%s136_s25 + $0x8] sm:$0xf] (%p66_p3) }
  0x14   : > { %154 = vst [vmem:[%s134_s26] sm:$0xf] (%p66_p3), %v153_v0 }
  0x15   : > { %156 = vst [vmem:[%s134_s26 + $0x4] sm:$0xf] %v155_v1 }
  0x16 PF: > { %p396_p8 = scmp.ge.s32.totalorder %s492_s13, 1  ;;  %p183_p9 = scmp.lt.s32.totalorder %s492_s13, 3 }
  0x18   : > { %p184_p10 = pnand %p396_p8, %p183_p9 }
  0x19   : > { %s190_s27 = sand.u32 (!%p184_p10), 1, %s476_s9  }
  0x1a   : > { %187 = sbr.rel (%p184_p10) target bundleno = 178 (0xb2), region = 65  ;;  %s397_s28 = sshll.u32 (!%p184_p10), %s190_s27, 3 }
  0x1b   : > { %s192_s29 = scalar_lea.vmem (!%p184_p10), [#allocation2], %s397_s28  ;;  %s398_s4 = sshll.u32 (!%p184_p10), %s190_s27, 4 }
  0x1c   : > { %s214_s5 = scalar_lea.vmem (!%p184_p10), [#allocation3], %s398_s4 }
  0x1f   : > { %v413_v2 = vld [vmem:[%s192_s29] sm:$0xff]  ;;  %vm238_vm0 = vcmask 130048   ;;  %s409_s6 = sshll.u32 (%p544_p6), %s484_s11, 3 }
  0x20   : > { %v412_v3 = vld [vmem:[%s584_s0] sm:$0xff]  ;;  %249 = vmatpush.bf16.msra.mxu0 %v413_v2  ;;  %s269_s9 = scalar_lea.vmem (%p544_p6), %s586_s2, %s409_s6 }
  0x23   : > { %407 = vmatmul.msk.bf16.vlgmr.msra.gmra.mxu0 %vm238_vm0, %v412_v3 }
  0xa0   : > { %v251_v4 = vpop.f32.mrf.mxu0 }
  0xa1   : > { %256 = vst [vmem:[%s214_s5] sm:$0xff] %v251_v4 }
  0xa5   : > { %264 = sbr.rel (!%p544_p6) target bundleno = 178 (0xb2), region = 73 }
  0xa8   : > { %v253_v5 = vpop.f32.mrf.mxu0  ;;  %v300_v6 = vld [vmem:[%s214_s5] sm:$0xff] (%p544_p6) }
  0xa9   : > { %257 = vst [vmem:[%s214_s5 + $0x8] sm:$0xff] %v253_v5 }
  0xaa   : > { %301 = vst [vmem:[%s269_s9] sm:$0xff] %v300_v6 }
  0xb0   : > { %v302_v7 = vld [vmem:[%s214_s5 + $0x8] sm:$0xff] }
  0xb1   : > { %303 = vst [vmem:[%s269_s9 + $0x10] sm:$0xff] %v302_v7 }
  0xb2 PF: > { %s12_s13 = sadd.s32 1, %s492_s13   ;;  %s588_s9 = smov %s480_s10 }
  0xb3   : > { %p9_p11 = scmp.ge.s32.totalorder %s12_s13, 4   ;;  %s589_s10 = smov %s549_s19 }
  0xb4   : > { %s590_s11 = smov %s488_s12  ;;  %s591_s12 = smov %s593_s14 }
  0xb5   :  { %11 = sbr.rel (!%p9_p11) target bundleno = 3 (0x3), region = 145 }

</bundles_post_ra>
